<compile_context>
chip_gen: v7x
topology: tpu7x:2x2x1
jax: 0.10.0
libtpu: 0.0.40
codegen_flags: <defaults>
</compile_context>

<pallas_src>
import functools

import jax
import jax.numpy as jnp
from jax import lax
from jax.experimental import pallas as pl
from jax.experimental.pallas import tpu as pltpu

EPS = 1e-5  # torch.nn.LayerNorm default


def prenorm_kernel(x_ref, w_ref, b_ref, o_ref):
    """Fused LayerNorm(last dim) + Linear for one tile of rows.

    x_ref: (TR, D)  input tokens (tile of rows), original dtype
    w_ref: (D, D)   bf16 folded weight (gamma already multiplied in)
    b_ref: (1, D)   f32 folded bias    (beta @ W + b)
    o_ref: (TR, D)  output tile (same dtype as x)
    """
    x = x_ref[...].astype(jnp.float32)

    # LayerNorm statistics in f32 (biased variance, eps inside rsqrt -> torch semantics).
    mean = jnp.mean(x, axis=-1, keepdims=True)
    centered = x - mean
    var = jnp.mean(centered * centered, axis=-1, keepdims=True)
    xn = centered * lax.rsqrt(var + EPS)

    # fn(...) == Linear(dim, dim) on the MXU: bf16 operands, f32 accumulation.
    acc = jnp.dot(
        xn.astype(jnp.bfloat16), w_ref[...], preferred_element_type=jnp.float32
    )
    o_ref[...] = (acc + b_ref[...]).astype(o_ref.dtype)


def _round_up(a, b):
    return (a + b - 1) // b * b


def _vmem_capacity_bytes():
    # Per-generation VMEM: 128 MiB on v5e/v6e, 64 MiB per TensorCore on v7x.
    try:
        return int(pltpu.get_tpu_info().vmem_capacity_bytes)
    except Exception:
        return 64 << 20  # assume the smallest (v7x per-TC) if the query fails


@functools.partial(jax.jit, static_argnames=("tile_rows",))
def prenorm_forward(x, gamma, beta, w, b, *, tile_rows=1024):
    """x: (B, N, D) -> (B, N, D).  Output dtype follows x (f32 or bf16)."""
    B, N, D = x.shape
    assert D % 128 == 0, "embedding dim should be a multiple of 128 (lane-dense stores)"
    rows = B * N

    # Fold LayerNorm affine into the linear layer (f32), ship W to the MXU as bf16.
    gamma32 = gamma.astype(jnp.float32)
    beta32 = beta.astype(jnp.float32)
    w32 = w.astype(jnp.float32)
    w_folded = (gamma32[:, None] * w32).astype(jnp.bfloat16)            # (D, D) bf16
    b_folded = (beta32 @ w32 + b.astype(jnp.float32)).reshape(1, D)     # (1, D) f32

    itemsize = jnp.dtype(x.dtype).itemsize
    row_multiple = max(8, 32 // itemsize)   # 8 for f32, 16 for bf16 (sublane packing)

    # Per-generation VMEM budget with headroom for compiler-internal scratch.
    vmem_cap = _vmem_capacity_bytes()
    vmem_ceiling = int(min(vmem_cap * 4 // 5, 100 << 20))  # ~51 MiB v7x, 100 MiB v5e/v6e
    w_bytes = D * D * 2          # single-buffered bf16 W
    bias_bytes = D * 4
    headroom = 4 << 20
    per_row_bytes = 2 * 2 * D * itemsize   # x + out tiles, double-buffered
    max_tile = max(row_multiple,
                   (vmem_ceiling - w_bytes - bias_bytes - headroom) // per_row_bytes)
    max_tile = (max_tile // row_multiple) * row_multiple

    if rows < row_multiple:
        tile = rows               # single block == full array extent (allowed)
    else:
        tile = min(tile_rows, max_tile,
                   max(row_multiple, (rows // row_multiple) * row_multiple))
        # Keep >= 4 grid steps when there is enough work so the "parallel" row axis
        # can shard across both v7x TensorCores.
        min_steps = 4
        if pl.cdiv(rows, tile) < min_steps and rows > min_steps * row_multiple:
            tile = max(row_multiple,
                       _round_up(pl.cdiv(rows, min_steps), row_multiple))

    grid = pl.cdiv(rows, tile)    # ragged last block handled by Pallas (no pad copy)

    needed = 2 * 2 * tile * D * itemsize + w_bytes + bias_bytes + headroom
    vmem_limit = int(min(max(needed, 32 << 20), vmem_ceiling))

    x2 = x.reshape(rows, D)

    out2 = pl.pallas_call(
        prenorm_kernel,
        out_shape=jax.ShapeDtypeStruct((rows, D), x.dtype),
        grid_spec=pltpu.PrefetchScalarGridSpec(
            num_scalar_prefetch=0,
            grid=(grid,),
            in_specs=[
                pl.BlockSpec((tile, D), lambda i: (i, 0)),            # x tile
                pl.BlockSpec((D, D), lambda i: (0, 0),
                             pipeline_mode=pl.Buffered(1)),           # folded W (const)
                pl.BlockSpec((1, D), lambda i: (0, 0),
                             pipeline_mode=pl.Buffered(1)),           # folded bias
            ],
            out_specs=pl.BlockSpec((tile, D), lambda i: (i, 0)),
        ),
        compiler_params=pltpu.CompilerParams(
            dimension_semantics=("parallel",),   # megacore row split on v7x
            vmem_limit_bytes=vmem_limit,
        ),
    )(x2, w_folded, b_folded)

    return out2.reshape(B, N, D)


def prenorm_reference(x, gamma, beta, w, b):
    xf = x.astype(jnp.float32)
    mean = jnp.mean(xf, axis=-1, keepdims=True)
    var = jnp.mean((xf - mean) ** 2, axis=-1, keepdims=True)
    xn = (xf - mean) / jnp.sqrt(var + EPS)
    y = xn * gamma.astype(jnp.float32) + beta.astype(jnp.float32)
    return (y @ w.astype(jnp.float32) + b.astype(jnp.float32)).astype(x.dtype)


def _max_rel_err(out, ref):
    num = jnp.max(jnp.abs(out.astype(jnp.float32) - ref.astype(jnp.float32)))
    den = jnp.max(jnp.abs(ref.astype(jnp.float32))) + 1e-6
    return float(num / den)


if __name__ == "__main__":
    # Small but realistic ViT shapes: 2 images x (64 patches + CLS token), D=128.
    # rows = 130 is not a multiple of the row tile -> exercises the no-pad ragged
    # last-block path.
    B, N, D = 2, 65, 128

    key = jax.random.PRNGKey(0)
    kx, kg, kb, kw, kbi = jax.random.split(key, 5)

    x = jax.random.normal(kx, (B, N, D), dtype=jnp.float32)

    # Deterministic parameter init (synthetic, not a checkpoint load).
    gamma = jnp.ones((D,), jnp.float32) + 0.01 * jax.random.normal(kg, (D,), jnp.float32)
    beta = 0.01 * jax.random.normal(kb, (D,), jnp.float32)
    w = jax.random.normal(kw, (D, D), jnp.float32) / jnp.sqrt(D)  # fn = Linear(dim, dim)
    b = 0.01 * jax.random.normal(kbi, (D,), jnp.float32)

    # f32 I/O path.
    out = jax.block_until_ready(prenorm_forward(x, gamma, beta, w, b))
    ref = prenorm_reference(x, gamma, beta, w, b)
    assert out.shape == (B, N, D)
    err = _max_rel_err(out, ref)
    assert err < 3e-2, f"f32 path mismatch vs reference: rel_err={err}"

    # bf16 I/O path (halves HBM traffic; LayerNorm stats stay f32 in-kernel).
    xb = x.astype(jnp.bfloat16)
    outb = jax.block_until_ready(prenorm_forward(xb, gamma, beta, w, b))
    refb = prenorm_reference(xb, gamma, beta, w, b)
    assert outb.shape == (B, N, D) and outb.dtype == jnp.bfloat16
    errb = _max_rel_err(outb, refb)
    assert errb < 5e-2, f"bf16 path mismatch vs reference: rel_err={errb}"

    print("KERNEL_OK")
</pallas_src>

<mosaic_0001>
module attributes {stable_mosaic.version = 11 : i64} {
  func.func @prenorm_kernel(%arg0: i32, %arg1: memref<40x128xf32, #tpu.memory_space<vmem>>, %arg2: memref<128x128xbf16, #tpu.memory_space<vmem>>, %arg3: memref<1x128xf32, #tpu.memory_space<vmem>>, %arg4: memref<40x128xf32, #tpu.memory_space<vmem>>) attributes {dimension_semantics = [#tpu.dimension_semantics<parallel>], iteration_bounds = array<i64: 4>, scalar_prefetch = 0 : i64, scratch_operands = 0 : i64, tpu.core_type = #tpu.core_type<tc>, window_params = [{transform_indices = @transform_0, window_bounds = array<i64: 40, 128>}, {pipeline_mode = #tpu.pipeline_mode<synchronous>, transform_indices = @transform_1, window_bounds = array<i64: 128, 128>}, {pipeline_mode = #tpu.pipeline_mode<synchronous>, transform_indices = @transform_2, window_bounds = array<i64: 1, 128>}, {transform_indices = @transform_3, window_bounds = array<i64: 40, 128>}]} {
    %c0 = arith.constant 0 : index
    %c0_0 = arith.constant 0 : index
    %0 = vector.load %arg1[%c0, %c0_0] : memref<40x128xf32, #tpu.memory_space<vmem>>, vector<40x128xf32>
    %cst = arith.constant dense<0.000000e+00> : vector<40xf32>
    %1 = vector.multi_reduction <add>, %0, %cst [1] : vector<40x128xf32> to vector<40xf32>
    %2 = vector.shape_cast %1 : vector<40xf32> to vector<40x1xf32>
    %cst_1 = arith.constant 1.280000e+02 : f32
    %3 = vector.broadcast %cst_1 : f32 to vector<40x1xf32>
    %4 = arith.divf %2, %3 : vector<40x1xf32>
    %5 = vector.broadcast %4 : vector<40x1xf32> to vector<40x128xf32>
    %6 = arith.subf %0, %5 : vector<40x128xf32>
    %7 = arith.mulf %6, %6 : vector<40x128xf32>
    %cst_2 = arith.constant dense<0.000000e+00> : vector<40xf32>
    %8 = vector.multi_reduction <add>, %7, %cst_2 [1] : vector<40x128xf32> to vector<40xf32>
    %9 = vector.shape_cast %8 : vector<40xf32> to vector<40x1xf32>
    %cst_3 = arith.constant 1.280000e+02 : f32
    %10 = vector.broadcast %cst_3 : f32 to vector<40x1xf32>
    %11 = arith.divf %9, %10 : vector<40x1xf32>
    %cst_4 = arith.constant 9.99999974E-6 : f32
    %12 = vector.broadcast %cst_4 : f32 to vector<40x1xf32>
    %13 = arith.addf %11, %12 : vector<40x1xf32>
    %14 = math.rsqrt %13 : vector<40x1xf32>
    %15 = vector.broadcast %14 : vector<40x1xf32> to vector<40x128xf32>
    %16 = arith.mulf %6, %15 : vector<40x128xf32>
    %17 = arith.truncf %16 : vector<40x128xf32> to vector<40x128xbf16>
    %c0_5 = arith.constant 0 : index
    %c0_6 = arith.constant 0 : index
    %18 = vector.load %arg2[%c0_5, %c0_6] : memref<128x128xbf16, #tpu.memory_space<vmem>>, vector<128x128xbf16>
    %cst_7 = arith.constant dense<0.000000e+00> : vector<40x128xf32>
    %19 = tpu.matmul %17, %18, %cst_7 {dimension_numbers = #tpu.dot_dimension_numbers<[1], [0], [0], [1], [0, 0, 1, 1], [], []>} : vector<40x128xbf16>, vector<128x128xbf16>, vector<40x128xf32> -> vector<40x128xf32>
    %c0_8 = arith.constant 0 : index
    %c0_9 = arith.constant 0 : index
    %20 = vector.load %arg3[%c0_8, %c0_9] : memref<1x128xf32, #tpu.memory_space<vmem>>, vector<1x128xf32>
    %21 = vector.broadcast %20 : vector<1x128xf32> to vector<40x128xf32>
    %22 = arith.addf %19, %21 : vector<40x128xf32>
    %c0_10 = arith.constant 0 : index
    %c0_11 = arith.constant 0 : index
    %23 = vector.load %arg4[%c0_10, %c0_11] : memref<40x128xf32, #tpu.memory_space<vmem>>, vector<40x128xf32>
    tpu.vector_store %arg4[%c0_10, %c0_11], %22 {strides = array<i32>} : memref<40x128xf32, #tpu.memory_space<vmem>>, vector<40x128xf32>,
    return
  }
  func.func @transform_0(%arg0: i32) -> (i32, i32) {
    %c0_i32 = arith.constant 0 : i32
    %c0_i32_0 = arith.constant 0 : i32
    return %arg0, %c0_i32 : i32, i32
  }
  func.func @transform_1(%arg0: i32) -> (i32, i32) {
    %c0_i32 = arith.constant 0 : i32
    %c0_i32_0 = arith.constant 0 : i32
    %c0_i32_1 = arith.constant 0 : i32
    return %c0_i32, %c0_i32_0 : i32, i32
  }
  func.func @transform_2(%arg0: i32) -> (i32, i32) {
    %c0_i32 = arith.constant 0 : i32
    %c0_i32_0 = arith.constant 0 : i32
    %c0_i32_1 = arith.constant 0 : i32
    return %c0_i32, %c0_i32_0 : i32, i32
  }
  func.func @transform_3(%arg0: i32) -> (i32, i32) {
    %c0_i32 = arith.constant 0 : i32
    %c0_i32_0 = arith.constant 0 : i32
    return %arg0, %c0_i32 : i32, i32
  }
}

</mosaic_0001>

<bundles_post_ra>
// kernel: prenorm_forward.1
= control target key start
LH: loop header
LB: loop body
LE: loop exit
PB: predicated region body
PF: predicated region fallthrough
CT: control target
= control target key end

     0   :  { %s928_s12 = smov 0   ;;  %s930_s13 = smov 0   ;;  %s1103_s0 = inlined_call_operand.vmem [shape: f32[130,128], index: 0, kind: input, shape index: {}]   ;;  %s1104_s1 = inlined_call_operand.vmem [shape: bf16[128,128], index: 1, kind: input, shape index: {}]   ;;  %s1105_s2 = inlined_call_operand.vmem [shape: f32[1,128], index: 2, kind: input, shape index: {}]   ;;  %s1106_s3 = inlined_call_operand.vmem [shape: f32[130,128], index: 3, kind: output, shape index: {}]  }
   0x1   :  { %s932_s14 = smov 0  }
   0x2 LB: > { %s941_s15 = sadd.s32 4294967295, %s872_s14   ;;  %s943_s16 = sadd.s32 1, %s872_s14   ;;  %s872_s14 = sphi %s932_s14, %s1113_s14   ;;  %s868_s13 = sphi %s930_s13, %s1112_s13   ;;  %s864_s12 = sphi %s928_s12, %s1111_s12  }
   0x3   : > { %s85_s17 = ssub.s32 %s872_s14, %s943_s16  ;;  %s88_s18 = sadd.s32 1, %s868_s13 }
   0x4   : > { %p86_p0 = scmp.eq.s32.totalorder %s85_s17, 0  ;;  %p98_p1 = scmp.ne.s32.totalorder %s868_s13, %s864_s12 }
   0x5   : > { %p99_p2 = scmp.eq.s32.totalorder %s941_s15, 3  ;;  %p625_p3 = scmp.ge.s32.totalorder %s872_s14, 1 }
   0x6   : > { %s951_s19 = scalar_select %p86_p0, %s868_s13, %s88_s18  }
   0x7   : > { %p953_p4 = por %p99_p2, %p98_p1  ;;  %p146_p5 = scmp.lt.s32.totalorder %s872_s14, 5 }
   0x9   : > { %p147_p6 = pnand %p625_p3, %p146_p5 }
   0xa   : > { %s958_s21 = smul.u32 (!%p147_p6), 5, %s941_s15  ;;  %v796_v5 = vld [vmem:[%s1104_s1] sm:$0xff] (!%p147_p6)   ;;  %v906_v6 = vmov (!%p147_p6), 0.0   ;;  %v797_v7 = vld [vmem:[%s1104_s1 + $0x8] sm:$0xff] (!%p147_p6)   ;;  %v798_v28 = vld [vmem:[%s1104_s1 + $0x10] sm:$0xff] (!%p147_p6)   ;;  %vm907_vm0 = vmmov (!%p147_p6), 0  }
   0xb   : > { %150 = sbr.rel (%p147_p6) target bundleno = 620 (0x26c), region = 32  ;;  %688 = vmatprep.subr.bf16.mxu1 (!%p147_p6), %v906_v6  ;;  %660 = vmatprep.subr.bf16.mxu0 (!%p147_p6), %v906_v6  ;;  %v799_v29 = vld [vmem:[%s1104_s1 + $0x18] sm:$0xff] (!%p147_p6)   ;;  %v800_v30 = vld [vmem:[%s1104_s1 + $0x20] sm:$0xff] (!%p147_p6)   ;;  %v801_v31 = vld [vmem:[%s1104_s1 + $0x28] sm:$0xff] (!%p147_p6)  }
   0xc   : > { %p178_p7 = scmp.lt.s32.totalorder (!%p147_p6), %s958_s21, 16  ;;  %696 = vmatpush3.bf16.msra.mxu1 (!%p147_p6), %v796_v5  ;;  %661 = vmatpush3.bf16.msra.mxu0 (!%p147_p6), %v796_v5  ;;  %v802_v32 = vld [vmem:[%s1104_s1 + $0x30] sm:$0xff] (!%p147_p6)   ;;  %v803_v33 = vld [vmem:[%s1104_s1 + $0x38] sm:$0xff] (!%p147_p6)   ;;  %v627_v62 = vld [vmem:[%s1105_s2] ss:$0 sm:$0xff] (!%p147_p6) }
   0xd   : > { %689 = vmatprep.subr.bf16.mxu1 (!%p147_p6), %v906_v6  ;;  %662 = vmatprep.subr.bf16.mxu0 (!%p147_p6), %v906_v6 }
   0xe   : > { %680 = vmatprep.mubr.msk.bf16.mxu1 (!%p147_p6), %vm907_vm0, %v906_v6  ;;  %676 = vmatprep.mubr.msk.bf16.mxu0 (!%p147_p6), %vm907_vm0, %v906_v6 }
  0x10   : > { %697 = vmatpush3.bf16.msra.mxu1 (!%p147_p6), %v797_v7  ;;  %663 = vmatpush3.bf16.msra.mxu0 (!%p147_p6), %v797_v7 }
  0x11   : > { %690 = vmatprep.subr.bf16.mxu1 (!%p147_p6), %v906_v6  ;;  %664 = vmatprep.subr.bf16.mxu0 (!%p147_p6), %v906_v6 }
  0x12   : > { %s179_s22 = scalar_select %p178_p7, %s958_s21, 16 }
  0x13   : > { %s648_s28 = smul.u32 (%p953_p4), 40, %s941_s15 }
  0x14   : > { %s626_s23 = sshll.u32 %s179_s22, 3  ;;  %698 = vmatpush3.bf16.msra.mxu1 %v798_v28  ;;  %665 = vmatpush3.bf16.msra.mxu0 %v798_v28 }
  0x15   : > { %s181_s26 = scalar_lea.vmem %s1103_s0, %s626_s23  ;;  %691 = vmatprep.subr.bf16.mxu1 %v906_v6  ;;  %666 = vmatprep.subr.bf16.mxu0 %v906_v6  ;;  %s170_s23 = sand.u32 1, %s864_s12  }
  0x16   : > { %v195_v0 = vld [vmem:[%s181_s26 + $0x10] sm:$0xff]  ;;  %v193_v1 = vld [vmem:[%s181_s26] sm:$0xff]  ;;  %v196_v2 = vld [vmem:[%s181_s26 + $0x18] sm:$0xff]  ;;  %s704_s24 = smul.u32 40, %s170_s23  ;;  %s397_s12 = ssub.s32 (%p953_p4), 17, %s958_s21 }
  0x17   : > { %202 = vadd.xlane.f32.xlu0 %v195_v0  ;;  %198 = vadd.xlane.f32.xlu1 %v193_v1  ;;  %v194_v3 = vld [vmem:[%s181_s26 + $0x8] sm:$0xff]  ;;  %v197_v4 = vld [vmem:[%s181_s26 + $0x20] sm:$0xff]  ;;  %p398_p8 = scmp.lt.s32.totalorder (%p953_p4), %s397_s12, 5  ;;  %s1054_s4 = scalar_lea.vmem (%p953_p4), %s1106_s3, %s648_s28  }
  0x18   : > { %699 = vmatpush3.bf16.msra.mxu1 %v799_v29  ;;  %667 = vmatpush3.bf16.msra.mxu0 %v799_v29  ;;  %s1040_s27 = scalar_lea.vmem [#allocation2], %s704_s24  }
  0x19   : > { %692 = vmatprep.subr.bf16.mxu1 %v906_v6  ;;  %668 = vmatprep.subr.bf16.mxu0 %v906_v6 }
  0x1b   : > { %204 = vadd.xlane.f32.xlu0 %v196_v2  ;;  %200 = vadd.xlane.f32.xlu1 %v194_v3 }
  0x1c   : > { %700 = vmatpush3.bf16.msra.mxu1 %v800_v30  ;;  %669 = vmatpush3.bf16.msra.mxu0 %v800_v30 }
  0x1d   : > { %693 = vmatprep.subr.bf16.mxu1 %v906_v6  ;;  %670 = vmatprep.subr.bf16.mxu0 %v906_v6 }
  0x1f   : > { %206 = vadd.xlane.f32.xlu0 %v197_v4 }
  0x20   : > { %701 = vmatpush3.bf16.msra.mxu1 %v801_v31  ;;  %671 = vmatpush3.bf16.msra.mxu0 %v801_v31 }
  0x21   : > { %694 = vmatprep.subr.bf16.mxu1 %v906_v6  ;;  %672 = vmatprep.subr.bf16.mxu0 %v906_v6 }
  0x24   : > { %702 = vmatpush3.bf16.msra.mxu1 %v802_v32  ;;  %673 = vmatpush3.bf16.msra.mxu0 %v802_v32 }
  0x25   : > { %695 = vmatprep.subr.bf16.mxu1 %v906_v6  ;;  %674 = vmatprep.subr.bf16.mxu0 %v906_v6 }
  0x28   : > { %703 = vmatpush3.bf16.msra.mxu1 %v803_v33  ;;  %675 = vmatpush3.bf16.msra.mxu0 %v803_v33 }
  0xa4   : > { %v203_v8 = vpop.xlane.xlu0 %202  ;;  %v199_v9 = vpop.xlane.xlu1 %198 }
  0xa5   : > { %v211_v10 = vmul.f32 0.0078125, %v203_v8  ;;  %v209_v11 = vmul.f32 0.0078125, %v199_v9 }
  0xa7   : > { %v977_v12 = vsub.f32 %v195_v0, %v211_v10  ;;  %v979_v13 = vsub.f32 %v193_v1, %v209_v11 }
  0xa8   : > { %v205_v14 = vpop.xlane.xlu0 %204  ;;  %v201_v15 = vpop.xlane.xlu1 %200 }
  0xa9   : > { %v212_v16 = vmul.f32 0.0078125, %v205_v14  ;;  %v221_v17 = vmul.f32 %v977_v12, %v977_v12  ;;  %v210_v18 = vmul.f32 0.0078125, %v201_v15  ;;  %v219_v21 = vmul.f32 %v979_v13, %v979_v13 }
  0xab   : > { %v983_v19 = vsub.f32 %v196_v2, %v212_v16  ;;  %228 = vadd.xlane.f32.xlu1 %v221_v17  ;;  %v985_v20 = vsub.f32 %v194_v3, %v210_v18 }
  0xac   : > { %v207_v22 = vpop.xlane.xlu0 %206 }
  0xad   : > { %v213_v23 = vmul.f32 0.0078125, %v207_v22  ;;  %v222_v24 = vmul.f32 %v983_v19, %v983_v19  ;;  %v220_v26 = vmul.f32 %v985_v20, %v985_v20 }
  0xaf   : > { %v991_v25 = vsub.f32 %v197_v4, %v213_v23  ;;  %230 = vadd.xlane.f32.xlu0 %v222_v24  ;;  %224 = vadd.xlane.f32.xlu1 %v219_v21 }
  0xb1   : > { %v223_v27 = vmul.f32 %v991_v25, %v991_v25 }
  0xb3   : > { %232 = vadd.xlane.f32.xlu1 %v223_v27  ;;  %226 = vadd.xlane.f32.xlu0 %v220_v26 }
 0x138   : > { %v229_v34 = vpop.xlane.xlu1 %228 }
 0x139   : > { %v236_v35 = vmul.f32 0.0078125, %v229_v34 }
 0x13b   : > { %v241_v36 = vadd.f32 1e-05, %v236_v35 }
 0x13c   : > { %v231_v37 = vpop.xlane.xlu0 %230  ;;  %v225_v38 = vpop.xlane.xlu1 %224 }
 0x13d   : > { %v237_v39 = vmul.f32 0.0078125, %v231_v37  ;;  %v234_v40 = vmul.f32 0.0078125, %v225_v38  ;;  %804 = vrsqrt.f32 %v241_v36 }
 0x13f   : > { %v242_v41 = vadd.f32 1e-05, %v237_v39  ;;  %v239_v42 = vadd.f32 1e-05, %v234_v40 }
 0x140   : > { %v227_v43 = vpop.xlane.xlu0 %226  ;;  %v233_v44 = vpop.xlane.xlu1 %232 }
 0x141   : > { %806 = vrsqrt.f32 %v242_v41  ;;  %v235_v45 = vmul.f32 0.0078125, %v227_v43  ;;  %v238_v46 = vmul.f32 0.0078125, %v233_v44 }
 0x142   : > { %808 = vrsqrt.f32 %v239_v42 }
 0x143   : > { %v240_v47 = vadd.f32 1e-05, %v235_v45  ;;  %v243_v48 = vadd.f32 1e-05, %v238_v46 }
 0x145   : > { %810 = vrsqrt.f32 %v240_v47 }
 0x146   : > { %812 = vrsqrt.f32 %v243_v48 }
 0x147   : > { %v805_v49 = vpop.eup %804 }
 0x148   : > { %v251_v51 = vmul.f32 %v805_v49, %v977_v12 }
 0x14b   : > { %v807_v50 = vpop.eup %806 }
 0x14c   : > { %v252_v52 = vmul.f32 %v807_v50, %v983_v19  ;;  %v809_v53 = vpop.eup %808 }
 0x14d   : > { %v249_v57 = vmul.f32 %v809_v53, %v979_v13 }
 0x14e   : > { %v255_v54 = vpack.c.bf16 %v252_v52, %v251_v51 }
 0x14f   : > { %v811_v55 = vpop.eup %810 }
 0x150   : > { %v813_v56 = vpop.eup %812  ;;  %681 = vmatmul.mubr.bf16.vlgmr.msra.gmra.mrb[0].mxu1 %v255_v54  ;;  %v250_v58 = vmul.f32 %v811_v55, %v985_v20 }
 0x151   : > { %684 = vmatprep.mubr.msk.bf16.mxu1 %vm907_vm0, %v906_v6  ;;  %v253_v60 = vmul.f32 %v813_v56, %v991_v25 }
 0x152   : > { %v254_v59 = vpack.c.bf16 %v250_v58, %v249_v57 }
 0x153   : > { %v256_v61 = vpack.c.bf16 %v253_v60, %v253_v60 }
 0x154   : > { %677 = vmatmul.mubr.bf16.vlgmr.msra.gmra.mrb[0].mxu0 %v254_v59 }
 0x158   : > { %685 = vmatmul.mubr.bf16.gmra.mrb[4].mxu1 %v256_v61 }
 0x223   : > { %v370_v63 = vpop.f32.mrb[0].mxu1 }
 0x224   : > { %v371_v0 = vadd.f32 %v627_v62, %v370_v63  ;;  %v682_v1 = vpop.f32.mrb[1].mxu1 }
 0x225   : > { %v373_v2 = vpop.f32.mrb[2].mxu1 }
 0x226   : > { %386 = vst [vmem:[%s1040_s27 + $0x10] sm:$0xff] %v371_v0  ;;  %v374_v3 = vadd.f32 %v627_v62, %v373_v2  ;;  %v683_v4 = vpop.f32.mrb[3].mxu1 }
 0x227   : > { %v362_v5 = vpop.f32.mrb[0].mxu0 }
 0x228   : > { %387 = vst [vmem:[%s1040_s27 + $0x18] sm:$0xff] %v374_v3  ;;  %v363_v6 = vadd.f32 %v627_v62, %v362_v5  ;;  %v678_v7 = vpop.f32.mrb[1].mxu0  ;;  %395 = sbr.rel (!%p953_p4) target bundleno = 620 (0x26c), region = 36 }
 0x229   : > { %v365_v8 = vpop.f32.mrb[2].mxu0 }
 0x22a   : > { %384 = vst [vmem:[%s1040_s27] sm:$0xff] %v363_v6  ;;  %v366_v9 = vadd.f32 %v627_v62, %v365_v8  ;;  %v679_v10 = vpop.f32.mrb[3].mxu0 }
 0x22b   : > { %v378_v11 = vpop.f32.mrb[4].mxu1 }
 0x22c   : > { %385 = vst [vmem:[%s1040_s27 + $0x8] sm:$0xff] %v366_v9  ;;  %v379_v12 = vadd.f32 %v627_v62, %v378_v11  ;;  %v686_v13 = vpop.f32.mrb[5].mxu1 }
 0x22d   : > { %v381_v14 = vpop.f32.mrb[6].mxu1 }
 0x22e   : > { %388 = vst [vmem:[%s1040_s27 + $0x20] sm:$0xff] %v379_v12  ;;  %v687_v15 = vpop.f32.mrb[7].mxu1 }
 0x22f   : > { %s1115_s12 = smov (!%p398_p8, %s397_s12), 5 }
 0x230   : > { %s636_s5 = sshll.u32 %s1115_s12, 7 }
 0x231   : > { %p639_p9 = scmp.eq.s32.totalorder %s636_s5, 0 }
 0x232   : > { %814 = sdivrem.u32 (!%p639_p9), %s1115_s12, 5 }
 0x233   : > { %406 = sbr.rel (%p639_p9) target bundleno = 620 (0x26c), region = 40 }
 0x23b   : > { %s1060_s20 = spop.drf %814 }
 0x23c   : > { %p640_p10 = scmp.le.s32.totalorder %s1060_s20, 0 }
 0x23d   : > { %s1108_s15 = smov (!%p640_p10), %s1054_s4  ;;  %s1109_s21 = smov (!%p640_p10), %s1040_s27 }
 0x23e   : > { %578 = sbr.rel (%p640_p10) target bundleno = 591 (0x24f), region = 116  ;;  %s1069_s6 = smov (!%p640_p10), 0  }
 0x23f   : > { %s1071_s7 = smov (!%p640_p10), 0  }
 0x245 LB: >> { %v478_v16 = vld [vmem:[%s880_s21] sm:$0xff]  ;;  %v480_v17 = vld [vmem:[%s880_s21 + $0x8] sm:$0xff]  ;;  %v482_v18 = vld [vmem:[%s880_s21 + $0x10] sm:$0xff]  ;;  %s488_s8 = sadd.s32 1, %s884_s6  ;;  %s472_s7 = sadd.s32 1, %s888_s7   ;;  %s888_s7 = sphi %s1071_s7, %s472_s7   ;;  %s884_s6 = sphi %s1069_s6, %s1110_s6   ;;  %s880_s21 = sphi %s1109_s21, %s493_s21   ;;  %s876_s15 = sphi %s1108_s15, %s494_s15  }
 0x246   : >> { %479 = vst [vmem:[%s876_s15] sm:$0xff] %v478_v16  ;;  %481 = vst [vmem:[%s876_s15 + $0x8] sm:$0xff] %v480_v17  ;;  %v484_v19 = vld [vmem:[%s880_s21 + $0x18] sm:$0xff]  ;;  %v486_v20 = vld [vmem:[%s880_s21 + $0x20] sm:$0xff]  ;;  %p489_p11 = scmp.ge.s32.totalorder %s488_s8, %s1060_s20  ;;  %p471_p12 = scmp.ge.s32.totalorder %s472_s7, %s1060_s20 }
 0x247   : >> { %483 = vst [vmem:[%s876_s15 + $0x10] sm:$0xff] %v482_v18  ;;  %485 = vst [vmem:[%s876_s15 + $0x18] sm:$0xff] %v484_v19 }
 0x248   : >> { %487 = vst [vmem:[%s876_s15 + $0x20] sm:$0xff] %v486_v20  ;;  %s1117_s8 = smov (%p489_p11, %s488_s8), 0  ;;  %474 = sbr.rel (!%p471_p12) target bundleno = 581 (0x245), region = 122 }
 0x249   : >> { %s491_s9 = smul.u32 40, %s1117_s8  ;;  %s1110_s6 = smov %s1117_s8 }
 0x24b   : >> { %s493_s21 = scalar_lea.vmem %s1040_s27, %s491_s9 [#allocation2]   ;;  %s494_s15 = scalar_lea.vmem %s1054_s4, %s491_s9  }
 0x24f PF: > { %816 = sdivrem.u32 %s1115_s12, 5 }
 0x250   : > { %s641_s10 = smul.u32 40, %s1060_s20 }
 0x252   : > { %s499_s11 = scalar_lea.vmem %s1040_s27, %s641_s10 [#allocation2]   ;;  %s501_s14 = scalar_lea.vmem %s1054_s4, %s641_s10  }
 0x258   : > { %s817_s17 = spop.drf %816 }
 0x259   : > { %p643_p13 = scmp.le.s32.totalorder %s817_s17, 0 }
 0x25a   : > { %s890_s18 = smov (!%p643_p13), %s501_s14   ;;  %s894_s22 = smov (!%p643_p13), %s499_s11  }
 0x25b   : > { %592 = sbr.rel (%p643_p13) target bundleno = 620 (0x26c), region = 127  ;;  %s898_s23 = smov (!%p643_p13), 0  }
 0x25c   : > { %s902_s24 = smov (!%p643_p13), 0  }
 0x262 LB: >> { %v511_v21 = vld [vmem:[%s896_s22] sm:$0xff]  ;;  %s513_s25 = sadd.s32 1, %s900_s23  ;;  %s505_s24 = sadd.s32 1, %s904_s24   ;;  %s904_s24 = sphi %s902_s24, %s505_s24   ;;  %s900_s23 = sphi %s898_s23, %s899_s23   ;;  %s896_s22 = sphi %s894_s22, %s518_s22   ;;  %s892_s18 = sphi %s890_s18, %s519_s18  }
 0x263   : >> { %512 = vst [vmem:[%s892_s18] sm:$0xff] %v511_v21  ;;  %p514_p0 = scmp.ge.s32.totalorder %s513_s25, %s817_s17  ;;  %p504_p1 = scmp.ge.s32.totalorder %s505_s24, %s817_s17 }
 0x265   : >> { %s1119_s25 = smov (%p514_p0, %s513_s25), 0  ;;  %507 = sbr.rel (!%p504_p1) target bundleno = 610 (0x262), region = 133 }
 0x266   : >> { %s644_s26 = sshll.u32 %s1119_s25, 3  ;;  %s899_s23 = smov %s1119_s25  }
 0x267   : >> { %s518_s22 = scalar_lea.vmem %s499_s11, %s644_s26 [#allocation2]   ;;  %s519_s18 = scalar_lea.vmem %s501_s14, %s644_s26  }
 0x26c PF: > { %p10_p2 = scmp.ge.s32.totalorder %s943_s16, 6   ;;  %s1111_s12 = smov %s868_s13 }
 0x26d   : > { %s1112_s13 = smov %s951_s19  ;;  %s1113_s14 = smov %s943_s16 }
 0x26e   :  { %12 = sbr.rel (!%p10_p2) target bundleno = 2 (0x2), region = 144 }

</bundles_post_ra>
